<compile_context>
chip_gen: v7x
topology: tpu7x:2x2x1
jax: 0.10.0
libtpu: 0.0.40
codegen_flags: <defaults>
</compile_context>

<pallas_src>
import numpy as np
import jax
import jax.numpy as jnp
from jax.experimental import pallas as pl
from jax.experimental.pallas import tpu as pltpu

C_IN, C1, C2, C3 = 32, 16, 8, 4   # channel widths of conva/convb/convc
LANE = 128                        # lane width of the padded output slab


def _conv_out_len(l_in, pad):
    return (l_in + 2 * pad - 2) // 2 + 1


def _layer_matrix(w, b, l_in, pad):
    """Per-sample Conv1d(k=2, s=2, pad) as a dense (C_out*L_out, C_in*L_in) map (float64)."""
    c_out, c_in, ksz = w.shape
    l_out = (l_in + 2 * pad - ksz) // 2 + 1
    a = np.zeros((c_out * l_out, c_in * l_in), np.float64)
    for co in range(c_out):
        for lo in range(l_out):
            for ci in range(c_in):
                for k in range(ksz):
                    li = 2 * lo + k - pad
                    if 0 <= li < l_in:
                        a[co * l_out + lo, ci * l_in + li] = w[co, ci, k]
    bvec = np.repeat(np.asarray(b, np.float64), l_out)
    return a, bvec, l_out


def init_params(key, l0=16):
    """PyTorch Conv1d default init + one-time float64 composition into a packed param slab."""
    def conv_init(k, c_out, c_in, ksize):
        k_w, k_b = jax.random.split(k)
        bound = 1.0 / np.sqrt(c_in * ksize)
        w = jax.random.uniform(k_w, (c_out, c_in, ksize), jnp.float32, -bound, bound)
        b = jax.random.uniform(k_b, (c_out,), jnp.float32, -bound, bound)
        return w, b

    ka, kb, kc = jax.random.split(key, 3)
    wa, ba = conv_init(ka, C1, C_IN, 2)
    wb, bb = conv_init(kb, C2, C1, 2)
    wc, bc = conv_init(kc, C3, C2, 2)

    # Compose the whole network (host-side, float64) into  out = x_flat @ W_eff + b_eff.
    a1, b1, l1 = _layer_matrix(np.asarray(wa, np.float64), np.asarray(ba, np.float64), l0, 0)
    a2, b2, l2 = _layer_matrix(np.asarray(wb, np.float64), np.asarray(bb, np.float64), l1, 1)
    a3, b3, l3 = _layer_matrix(np.asarray(wc, np.float64), np.asarray(bc, np.float64), l2, 1)
    w_eff = (a3 @ a2 @ a1).T                 # (C_IN*l0, C3*l3)
    b_eff = a3 @ (a2 @ b1 + b2) + b3         # (C3*l3,)

    k_dim = C_IN * l0
    out_dim = C3 * l3
    lane = max(LANE, ((out_dim + LANE - 1) // LANE) * LANE)

    # One packed slab: rows [0, k_dim) = W_eff (lane padded), row k_dim = b_eff,
    # row count padded to a multiple of 8.  Stored in bf16 (exactly the MXU input dtype).
    slab = np.zeros((k_dim + 8, lane), np.float32)
    slab[:k_dim, :out_dim] = w_eff
    slab[k_dim, :out_dim] = b_eff

    return {
        # original conv weights (kept only for the reference cross-check)
        "wa": wa, "ba": ba, "wb": wb, "bb": bb, "wc": wc, "bc": bc,
        # kernel-ready packed parameters
        "slab": jnp.asarray(slab, jnp.bfloat16),
    }


def _encode_affine_kernel(x_ref, slab_ref, o_ref):
    k = x_ref.shape[1]                                   # static: C_IN * L0
    w = slab_ref[0:k, :]                                 # (K, LANE)  bf16
    b = slab_ref[k:k + 1, :].astype(jnp.float32)         # (1, LANE)
    acc = jnp.dot(x_ref[...], w, preferred_element_type=jnp.float32)
    o_ref[...] = (acc + b).astype(o_ref.dtype)           # single unmasked (8,128) store


@jax.jit
def encode32small_forward(x, params):
    n, c_in, l0 = x.shape
    assert c_in == C_IN, c_in
    l3 = _conv_out_len(_conv_out_len(_conv_out_len(l0, 0), 1), 1)
    k_dim = C_IN * l0

    slab = params["slab"]
    assert slab.shape[0] == k_dim + 8, "param slab was composed for a different input length"
    lane = slab.shape[1]

    # Row-major (N, C*L) reshape already matches the composed map's flatten order
    # (no NCL->NLC transpose needed).  Pad rows to a multiple of 8 and cast to bf16.
    m_pad = max(8, ((n + 7) // 8) * 8)
    x_flat = x.reshape(n, k_dim).astype(jnp.bfloat16)
    x_pad = jnp.zeros((m_pad, k_dim), jnp.bfloat16).at[:n, :].set(x_flat)

    vmem = pl.BlockSpec(memory_space=pltpu.MemorySpace.VMEM)
    out_slab = pl.pallas_call(
        _encode_affine_kernel,
        out_shape=jax.ShapeDtypeStruct((m_pad, lane), jnp.float32),
        in_specs=[vmem, vmem],       # exactly 2 operand DMAs
        out_specs=vmem,
    )(x_pad, slab)

    # Tiny XLA glue: crop and return PyTorch's (N, C_out, L_out) layout
    # (flatten order of W_eff columns is already c3*L3 + l3).
    return out_slab[:n, :C3 * l3].reshape(n, C3, l3)


if __name__ == "__main__":
    key = jax.random.PRNGKey(0)
    k_x, k_p = jax.random.split(key)

    # Input implied by the module: batch=2, channels=32 (required by conva), length=16.
    x = jax.random.normal(k_x, (2, C_IN, 16), jnp.float32)
    params = init_params(k_p, l0=16)

    out = jax.block_until_ready(encode32small_forward(x, params))
    # conva -> (2,16,8), convb -> (2,8,5), convc -> (2,4,3)
    assert out.shape == (2, C3, 3), out.shape

    # Cross-check against a plain-XLA f32 reference of the original PyTorch module.
    def ref_forward(xv, p):
        def conv(v, w, b, pad):
            y = jax.lax.conv_general_dilated(
                v, w, window_strides=(2,), padding=[(pad, pad)],
                dimension_numbers=("NCH", "OIH", "NCH"))
            return y + b[None, :, None]
        v = conv(xv, p["wa"], p["ba"], 0)
        v = conv(v, p["wb"], p["bb"], 1)
        v = conv(v, p["wc"], p["bc"], 1)
        return v

    ref = jax.block_until_ready(jax.jit(ref_forward)(x, params))
    err = float(jnp.max(jnp.abs(out - ref)))
    assert err < 2e-2, f"max abs err vs reference: {err}"

    print("KERNEL_OK")
</pallas_src>

<mosaic_0001>
module attributes {stable_mosaic.version = 11 : i64} {
  func.func @_encode_affine_kernel(%arg0: memref<8x512xbf16, #tpu.memory_space<vmem>>, %arg1: memref<520x128xbf16, #tpu.memory_space<vmem>>, %arg2: memref<8x128xf32, #tpu.memory_space<vmem>>) attributes {dimension_semantics = [], scalar_prefetch = 0 : i64, scratch_operands = 0 : i64, tpu.core_type = #tpu.core_type<tc>} {
    %c0 = arith.constant 0 : index
    %c0_0 = arith.constant 0 : index
    %0 = vector.load %arg1[%c0, %c0_0] : memref<520x128xbf16, #tpu.memory_space<vmem>>, vector<512x128xbf16>
    %c512 = arith.constant 512 : index
    %c0_1 = arith.constant 0 : index
    %1 = vector.load %arg1[%c512, %c0_1] : memref<520x128xbf16, #tpu.memory_space<vmem>>, vector<1x128xbf16>
    %2 = arith.extf %1 : vector<1x128xbf16> to vector<1x128xf32>
    %c0_2 = arith.constant 0 : index
    %c0_3 = arith.constant 0 : index
    %3 = vector.load %arg0[%c0_2, %c0_3] : memref<8x512xbf16, #tpu.memory_space<vmem>>, vector<8x512xbf16>
    %cst = arith.constant dense<0.000000e+00> : vector<8x128xf32>
    %4 = tpu.matmul %3, %0, %cst {dimension_numbers = #tpu.dot_dimension_numbers<[1], [0], [0], [1], [0, 0, 1, 1], [], []>} : vector<8x512xbf16>, vector<512x128xbf16>, vector<8x128xf32> -> vector<8x128xf32>
    %5 = vector.broadcast %2 : vector<1x128xf32> to vector<8x128xf32>
    %6 = arith.addf %4, %5 : vector<8x128xf32>
    %c0_4 = arith.constant 0 : index
    %c0_5 = arith.constant 0 : index
    %7 = vector.load %arg2[%c0_4, %c0_5] : memref<8x128xf32, #tpu.memory_space<vmem>>, vector<8x128xf32>
    tpu.vector_store %arg2[%c0_4, %c0_5], %6 {strides = array<i32>} : memref<8x128xf32, #tpu.memory_space<vmem>>, vector<8x128xf32>,
    return
  }
}

</mosaic_0001>

<bundles_post_ra>
// kernel: encode32small_forward.1
= control target key start
LH: loop header
LB: loop body
LE: loop exit
PB: predicated region body
PF: predicated region fallthrough
CT: control target
= control target key end

     0   :  { %7 = vsyncpa [#allocation3], 0  ;;  %s533_s9 = smov [#allocation2]   ;;  %s572_s0 = inlined_call_operand.vmem [shape: bf16[8,512], index: 0, kind: input, shape index: {}]   ;;  %s573_s1 = inlined_call_operand.hbm [shape: bf16[520,128], index: 1, kind: input, shape index: {}]   ;;  %s574_s2 = inlined_call_operand.vmem [shape: f32[8,128], index: 2, kind: output, shape index: {}]  }
   0x1   :  { %s15_s10 = sshll.u32 %s533_s9, 4  ;;  %s509_s13 = scalar_lea.hbm %s573_s1, 4160  ;;  %s16_s10 = int_to_ptr.vmem [resolvable:$true] %s15_s10 }
   0x2   :  { %p510_p0 = scmp.ne.s32.totalorder %s573_s1, %s509_s13  ;;  %p513_p1 = scmp.lt.u32.totalorder %s509_s13, %s573_s1 }
   0x4   :  { %p515_p2 = pnand %p513_p1, %p510_p0 }
   0x6   :  { %518 = shalt.err (!%p515_p2)
}
   0x7   :  { %s519_s18 = scalar_lea.vmem %s16_s10, 4160  ;;  %p524_p4 = scmp.lt.s32.totalorder %s16_s10, %s16_s10 }
   0x8   :  { %p520_p3 = scmp.ne.s32.totalorder %s16_s10, %s519_s18  ;;  %p525_p5 = scmp.lt.s32.totalorder %s519_s18, %s519_s18 }
   0xa   :  { %p526_p6 = por %p525_p5, %p524_p4 }
   0xc   :  { %p527_p7 = pnand %p526_p6, %p520_p3 }
   0xe   :  { %530 = shalt.err (!%p527_p7)
}
   0xf   :  { %s534_s19 = smov 64   ;;  %s535_s20 = smov 4  }
  0x10   :  { %21 = dma.hbm_to_vmem [thread:$0]  %s573_s1, 4160, %s16_s10, [#allocation3], %s534_s19, %s534_s19, %s535_s20  }
  0x11   :  { %531 = dma.done.wait [#allocation3], 4160  }
  0x12   :  { %532 = vsyncadd [#allocation3], 4294963136  ;;  %v473_v0 = vld [vmem:[#allocation2 + $0x40] sm:$0xff]   ;;  %v477_v4 = vld [vmem:[#allocation2 + $0x48] sm:$0xff]   ;;  %v94_v38 = vlaneseq }
  0x13   :  { %v474_v1 = vld [vmem:[#allocation2 + $0xc0] sm:$0xff]   ;;  %426 = vmatprep.subr.bf16.mxu0 %v473_v0  ;;  %v478_v5 = vld [vmem:[#allocation2 + $0xc8] sm:$0xff]   ;;  %v481_v8 = vld [vmem:[#allocation2 + $0x50] sm:$0xff]  }
  0x14   :  { %v475_v2 = vld [vmem:[#allocation2] sm:$0xff]   ;;  %448 = vmatprep.subr.bf16.mxu1 %v474_v1  ;;  %v479_v6 = vld [vmem:[#allocation2 + $0x8] sm:$0xff]   ;;  %v482_v9 = vld [vmem:[#allocation2 + $0xd0] sm:$0xff]   ;;  %v95_v39 = vshrl.u32 %v94_v38, 7 }
  0x15   :  { %v476_v3 = vld [vmem:[#allocation2 + $0x80] sm:$0xff]   ;;  %427 = vmatpush3.bf16.msra.mxu0 %v475_v2  ;;  %v480_v7 = vld [vmem:[#allocation2 + $0x88] sm:$0xff]   ;;  %v483_v10 = vld [vmem:[#allocation2 + $0x10] sm:$0xff]  }
  0x16   :  { %449 = vmatpush3.bf16.msra.mxu1 %v476_v3  ;;  %428 = vmatprep.subr.bf16.mxu0 %v477_v4  ;;  %v484_v11 = vld [vmem:[#allocation2 + $0x90] sm:$0xff]   ;;  %v485_v12 = vld [vmem:[#allocation2 + $0x58] sm:$0xff]   ;;  %v489_v16 = vld [vmem:[#allocation2 + $0x60] sm:$0xff]   ;;  %v96_v42 = vsub.s32 0, %v95_v39 }
  0x17   :  { %450 = vmatprep.subr.bf16.mxu1 %v478_v5  ;;  %v486_v13 = vld [vmem:[#allocation2 + $0xd8] sm:$0xff]   ;;  %v490_v17 = vld [vmem:[#allocation2 + $0xe0] sm:$0xff]   ;;  %v493_v20 = vld [vmem:[#allocation2 + $0x68] sm:$0xff]  }
  0x18   :  { %v487_v14 = vld [vmem:[#allocation2 + $0x18] sm:$0xff]   ;;  %v491_v18 = vld [vmem:[#allocation2 + $0x20] sm:$0xff]   ;;  %v494_v21 = vld [vmem:[#allocation2 + $0xe8] sm:$0xff]  }
  0x19   :  { %429 = vmatpush3.bf16.msra.mxu0 %v479_v6  ;;  %v488_v15 = vld [vmem:[#allocation2 + $0x98] sm:$0xff]   ;;  %v492_v19 = vld [vmem:[#allocation2 + $0xa0] sm:$0xff]   ;;  %v495_v22 = vld [vmem:[#allocation2 + $0x28] sm:$0xff]  }
  0x1a   :  { %451 = vmatpush3.bf16.msra.mxu1 %v480_v7  ;;  %430 = vmatprep.subr.bf16.mxu0 %v481_v8  ;;  %v496_v23 = vld [vmem:[#allocation2 + $0xa8] sm:$0xff]   ;;  %v497_v24 = vld [vmem:[#allocation2 + $0x70] sm:$0xff]   ;;  %v501_v28 = vld [vmem:[#allocation2 + $0x78] sm:$0xff]  }
  0x1b   :  { %452 = vmatprep.subr.bf16.mxu1 %v482_v9  ;;  %v498_v25 = vld [vmem:[#allocation2 + $0xf0] sm:$0xff]   ;;  %v502_v29 = vld [vmem:[#allocation2 + $0xf8] sm:$0xff]   ;;  %v92_v32 = vld [vmem:[%s572_s0] sm:$0xff] }
  0x1c   :  { %v499_v26 = vld [vmem:[#allocation2 + $0x30] sm:$0xff]   ;;  %v503_v30 = vld [vmem:[#allocation2 + $0x38] sm:$0xff]   ;;  %v93_v33 = vld [vmem:[%s572_s0 + $0x8] sm:$0xff]  ;;  %v390_v34 = vcombine.low %v92_v32, %v92_v32  ;;  %v391_v35 = vcombine.high %v92_v32, %v92_v32 }
  0x1d   :  { %431 = vmatpush3.bf16.msra.mxu0 %v483_v10  ;;  %v500_v27 = vld [vmem:[#allocation2 + $0xb0] sm:$0xff]   ;;  %v504_v31 = vld [vmem:[#allocation2 + $0xb8] sm:$0xff]   ;;  %v392_v36 = vcombine.low %v93_v33, %v93_v33  ;;  %v393_v37 = vcombine.high %v93_v33, %v93_v33  ;;  %v90_v40 = vld [vmem:[#allocation2 + $0x100] sm:$0x1] }
  0x1e   :  { %453 = vmatpush3.bf16.msra.mxu1 %v484_v11  ;;  %432 = vmatprep.subr.bf16.mxu0 %v485_v12  ;;  %v91_v41 = vunpack.c.l.bf16 %v90_v40 }
  0x1f   :  { %454 = vmatprep.subr.bf16.mxu1 %v486_v13  ;;  %336 = vmatprep.mubr.bf16.mxu0 %v391_v35 }
  0x20   :  { %376 = vmatprep.mubr.bf16.mxu1 %v393_v37  ;;  %v97_v45 = vrot.slane %v91_v41, %v96_v42 }
  0x21   :  { %433 = vmatpush3.bf16.msra.mxu0 %v487_v14 }
  0x22   :  { %455 = vmatpush3.bf16.msra.mxu1 %v488_v15  ;;  %434 = vmatprep.subr.bf16.mxu0 %v489_v16 }
  0x23   :  { %456 = vmatprep.subr.bf16.mxu1 %v490_v17 }
  0x25   :  { %435 = vmatpush3.bf16.msra.mxu0 %v491_v18 }
  0x26   :  { %457 = vmatpush3.bf16.msra.mxu1 %v492_v19  ;;  %436 = vmatprep.subr.bf16.mxu0 %v493_v20 }
  0x27   :  { %458 = vmatprep.subr.bf16.mxu1 %v494_v21 }
  0x29   :  { %437 = vmatpush3.bf16.msra.mxu0 %v495_v22 }
  0x2a   :  { %459 = vmatpush3.bf16.msra.mxu1 %v496_v23  ;;  %438 = vmatprep.subr.bf16.mxu0 %v497_v24 }
  0x2b   :  { %460 = vmatprep.subr.bf16.mxu1 %v498_v25 }
  0x2d   :  { %439 = vmatpush3.bf16.msra.mxu0 %v499_v26 }
  0x2e   :  { %461 = vmatpush3.bf16.msra.mxu1 %v500_v27  ;;  %440 = vmatprep.subr.bf16.mxu0 %v501_v28 }
  0x2f   :  { %462 = vmatprep.subr.bf16.mxu1 %v502_v29 }
  0x31   :  { %441 = vmatpush3.bf16.msra.mxu0 %v503_v30 }
  0x32   :  { %463 = vmatpush3.bf16.msra.mxu1 %v504_v31 }
  0x34   :  { %337 = vmatmul.mubr.bf16.vlgmr.msra.gmra.mrb[0].mxu0 %v390_v34 }
  0x35   :  { %377 = vmatmul.mubr.bf16.vlgmr.msra.gmra.mrb[0].mxu1 %v392_v36 }
 0x107   :  { %v442_v43 = vpop.f32.mrb[0].mxu0 }
 0x108   :  { %v464_v44 = vpop.f32.mrb[0].mxu1  ;;  %v443_v46 = vpop.f32.mrb[1].mxu0 }
 0x109   :  { %v465_v47 = vpop.f32.mrb[1].mxu1  ;;  %v444_v48 = vadd.f32 %v443_v46, %v442_v43  ;;  %v445_v50 = vpop.f32.mrb[2].mxu0 }
 0x10a   :  { %v466_v49 = vadd.f32 %v465_v47, %v464_v44  ;;  %v467_v51 = vpop.f32.mrb[2].mxu1  ;;  %v446_v52 = vpop.f32.mrb[3].mxu0 }
 0x10b   :  { %v468_v53 = vpop.f32.mrb[3].mxu1  ;;  %v339_v54 = vadd.f32 %v444_v48, %v97_v45 }
 0x10d   :  { %v379_v55 = vadd.f32 %v466_v49, %v339_v54 }
 0x10f   :  { %384 = vst [vmem:[%s574_s2] sm:$0xff] %v379_v55 }
 0x110   :  { %389 = vsyncpa [#allocation3], 1 }

</bundles_post_ra>
